<compile_context>
chip_gen: v6e
topology: v6e:2x2x1
jax: 0.10.0
libtpu: 0.0.40
codegen_flags: <defaults>
</compile_context>

<pallas_src>
import functools

import jax
import jax.numpy as jnp
from jax import lax
from jax.experimental import pallas as pl
from jax.experimental.pallas import tpu as pltpu


def _layernorm_kernel(x_ref, g_ref, b_ref, o_ref, *, eps: float, f_real: int,
                      n_pad: int):
    # x_ref: (tr, F_k); g_ref/b_ref: (1, F_k) already float32; o_ref: (tr, F_k).
    # If n_pad > 0 the trailing lanes of x/g/b are zero and their outputs are
    # sliced off by the wrapper.
    x = x_ref[...].astype(jnp.float32)
    g = g_ref[...]
    b = b_ref[...]

    # Mean: padded lanes are zero so the plain sum is exact.
    mean = jnp.sum(x, axis=-1, keepdims=True) * (1.0 / f_real)

    # Two-pass variance (better conditioned than E[x^2]-E[x]^2); mask padded
    # lanes so they don't contribute (x=0 there would give d=-mean != 0).
    d = x - mean
    if n_pad:
        lane = lax.broadcasted_iota(jnp.int32, d.shape, dimension=1)
        d = jnp.where(lane < f_real, d, 0.0)

    # torch.std default is unbiased (ddof=1); eps is added to std (not var).
    # max(f_real-1, 1) guards F==1 (torch would give NaN; we return b).
    var = jnp.sum(d * d, axis=-1, keepdims=True) * (1.0 / max(f_real - 1, 1))
    std = jnp.sqrt(jnp.maximum(var, 0.0))

    # Per-row (tr, 1) reciprocal; exact (approx=False) to hold 1e-5 tolerance.
    inv = pl.reciprocal(std + eps, approx=False)

    y = d * inv * g + b
    o_ref[...] = y.astype(o_ref.dtype)


def _round_up(v, m):
    return ((v + m - 1) // m) * m


def _pick_tiling(rows_p, f_k, itemsize, sub):
    """Generation-aware row tile + scoped-VMEM budget."""
    try:
        info = pltpu.get_tpu_info()
        vmem_cap = int(getattr(info, "vmem_capacity_bytes", 0)) or 64 * 1024 * 1024
    except Exception:
        vmem_cap = 64 * 1024 * 1024  # conservative: v7x per-core VMEM

    big_vmem = vmem_cap >= 128 * 1024 * 1024          # v5e / v6e
    target_block_bytes = (6 if big_vmem else 3) * 1024 * 1024
    vmem_top = (64 if big_vmem else 36) * 1024 * 1024  # scoped-limit ceiling

    # Live bytes per tile row: double-buffered in+out tiles (native dtype)
    # plus ~5 simultaneously-live f32 temps (x, d, d*d, y, cast buffer).
    per_row_live = f_k * (2 * 2 * itemsize + 5 * 4)

    tr = max(sub, target_block_bytes // (f_k * itemsize))
    # keep ~25% VMEM headroom for compiler temps
    tr = min(tr, max(sub, (vmem_top * 3 // 4) // per_row_live))
    # ensure >= ~8 grid steps when rows permit (feeds both v7x TensorCores,
    # amortizes per-step overhead elsewhere at negligible cost)
    tr = min(tr, max(sub, _round_up(pl.cdiv(rows_p, 8), sub)))
    tr = min(tr, rows_p)
    tr = max(sub, (tr // sub) * sub)

    vmem_bytes = int(per_row_live * tr * 1.25) + 4 * f_k * 4 + (1 << 20)
    vmem_bytes = max(4 * 1024 * 1024, min(vmem_bytes, vmem_top))
    return tr, vmem_bytes


def layer_norm(x, g, b, eps=1e-6):
    """x: (..., F); g, b: (F,). Returns same shape/dtype as x."""
    orig_shape = x.shape
    f = int(orig_shape[-1])
    x2 = x.reshape(-1, f)
    rows = int(x2.shape[0])

    itemsize = jnp.dtype(x.dtype).itemsize
    sub = 8 * max(1, 4 // itemsize)    # sublane packing: f32 -> 8, bf16 -> 16

    # Feature padding only when nearly lane-aligned already (pad <= ~6%).
    # Otherwise block last dim == F (full array dim) with masked stores —
    # far less HBM traffic than padding + slicing for small F.
    f_pad128 = _round_up(f, 128)
    lane_pad = (f_pad128 != f) and (f_pad128 - f) * 16 <= f
    f_k = f_pad128 if lane_pad else f

    # Rows: no tile-multiple padding (Pallas masks the ragged last block on
    # writeback); only round up to the sublane multiple if needed (rare).
    rows_p = _round_up(rows, sub)

    tr, vmem_bytes = _pick_tiling(rows_p, f_k, itemsize, sub)
    grid = pl.cdiv(rows_p, tr)

    pad_rows = rows_p - rows
    pad_f = f_k - f
    if pad_rows or pad_f:
        x2 = jnp.pad(x2, ((0, pad_rows), (0, pad_f)))

    # Pre-cast tiny (1, F) params to f32 once in the wrapper; the constant
    # index_map keeps their block VMEM-resident across all grid steps.
    g2 = g.astype(jnp.float32).reshape(1, f)
    b2 = b.astype(jnp.float32).reshape(1, f)
    if pad_f:
        g2 = jnp.pad(g2, ((0, 0), (0, pad_f)))
        b2 = jnp.pad(b2, ((0, 0), (0, pad_f)))

    kernel = functools.partial(_layernorm_kernel, eps=float(eps), f_real=f,
                               n_pad=int(pad_f))

    out = pl.pallas_call(
        kernel,
        out_shape=jax.ShapeDtypeStruct((rows_p, f_k), x.dtype),
        grid_spec=pltpu.PrefetchScalarGridSpec(
            num_scalar_prefetch=0,
            grid=(grid,),
            in_specs=[
                pl.BlockSpec((tr, f_k), lambda i: (i, 0)),
                pl.BlockSpec((1, f_k), lambda i: (0, 0)),
                pl.BlockSpec((1, f_k), lambda i: (0, 0)),
            ],
            out_specs=pl.BlockSpec((tr, f_k), lambda i: (i, 0)),
        ),
        compiler_params=pltpu.CompilerParams(
            dimension_semantics=("parallel",),
            vmem_limit_bytes=int(vmem_bytes),
        ),
    )(x2, g2, b2)

    if pad_rows or pad_f:
        out = out[:rows, :f]
    return out.reshape(orig_shape)


def _reference(x, g, b, eps=1e-6):
    xf = x.astype(jnp.float32)
    mean = jnp.mean(xf, axis=-1, keepdims=True)
    # unbiased std (ddof=1) to match torch.std default
    std = jnp.std(xf, axis=-1, keepdims=True, ddof=1)
    return (g * (xf - mean) / (std + eps) + b).astype(x.dtype)


if __name__ == "__main__":
    key = jax.random.PRNGKey(0)
    batch, seq, hidden = 2, 8, 32
    x = jax.random.normal(key, (batch, seq, hidden), dtype=jnp.float32)

    # Deterministic parameter init matching nn.Parameter(torch.ones/zeros(features))
    g = jnp.ones((hidden,), dtype=jnp.float32)
    b = jnp.zeros((hidden,), dtype=jnp.float32)

    out = layer_norm(x, g, b, eps=1e-6)
    out = jax.block_until_ready(out)

    ref = _reference(x, g, b, eps=1e-6)
    assert out.shape == x.shape and out.dtype == x.dtype
    assert jnp.max(jnp.abs(out - ref)) < 1e-5, "mismatch vs reference"

    print("KERNEL_OK")
</pallas_src>

<mosaic_0001>
module attributes {stable_mosaic.version = 11 : i64} {
  func.func @_layernorm_kernel(%arg0: i32, %arg1: memref<8x32xf32, #tpu.memory_space<vmem>>, %arg2: memref<1x32xf32, #tpu.memory_space<vmem>>, %arg3: memref<1x32xf32, #tpu.memory_space<vmem>>, %arg4: memref<8x32xf32, #tpu.memory_space<vmem>>) attributes {dimension_semantics = [#tpu.dimension_semantics<parallel>], iteration_bounds = array<i64: 2>, scalar_prefetch = 0 : i64, scratch_operands = 0 : i64, tpu.core_type = #tpu.core_type<tc>, window_params = [{transform_indices = @transform_0, window_bounds = array<i64: 8, 32>}, {pipeline_mode = #tpu.pipeline_mode<synchronous>, transform_indices = @transform_1, window_bounds = array<i64: 1, 32>}, {pipeline_mode = #tpu.pipeline_mode<synchronous>, transform_indices = @transform_2, window_bounds = array<i64: 1, 32>}, {transform_indices = @transform_3, window_bounds = array<i64: 8, 32>}]} {
    %c0 = arith.constant 0 : index
    %c0_0 = arith.constant 0 : index
    %0 = vector.load %arg1[%c0, %c0_0] : memref<8x32xf32, #tpu.memory_space<vmem>>, vector<8x32xf32>
    %c0_1 = arith.constant 0 : index
    %c0_2 = arith.constant 0 : index
    %1 = vector.load %arg2[%c0_1, %c0_2] : memref<1x32xf32, #tpu.memory_space<vmem>>, vector<1x32xf32>
    %c0_3 = arith.constant 0 : index
    %c0_4 = arith.constant 0 : index
    %2 = vector.load %arg3[%c0_3, %c0_4] : memref<1x32xf32, #tpu.memory_space<vmem>>, vector<1x32xf32>
    %cst = arith.constant dense<0.000000e+00> : vector<8xf32>
    %3 = vector.multi_reduction <add>, %0, %cst [1] : vector<8x32xf32> to vector<8xf32>
    %4 = vector.shape_cast %3 : vector<8xf32> to vector<8x1xf32>
    %cst_5 = arith.constant 3.125000e-02 : f32
    %5 = vector.broadcast %cst_5 : f32 to vector<8x1xf32>
    %6 = arith.mulf %4, %5 : vector<8x1xf32>
    %7 = vector.broadcast %6 : vector<8x1xf32> to vector<8x32xf32>
    %8 = arith.subf %0, %7 : vector<8x32xf32>
    %9 = arith.mulf %8, %8 : vector<8x32xf32>
    %cst_6 = arith.constant dense<0.000000e+00> : vector<8xf32>
    %10 = vector.multi_reduction <add>, %9, %cst_6 [1] : vector<8x32xf32> to vector<8xf32>
    %11 = vector.shape_cast %10 : vector<8xf32> to vector<8x1xf32>
    %cst_7 = arith.constant 0.0322580636 : f32
    %12 = vector.broadcast %cst_7 : f32 to vector<8x1xf32>
    %13 = arith.mulf %11, %12 : vector<8x1xf32>
    %cst_8 = arith.constant 0.000000e+00 : f32
    %14 = vector.broadcast %cst_8 : f32 to vector<8x1xf32>
    %15 = arith.maximumf %13, %14 : vector<8x1xf32>
    %16 = math.sqrt %15 : vector<8x1xf32>
    %cst_9 = arith.constant 9.99999997E-7 : f32
    %17 = vector.broadcast %cst_9 : f32 to vector<8x1xf32>
    %18 = arith.addf %16, %17 : vector<8x1xf32>
    %19 = tpu.reciprocal %18 : vector<8x1xf32> -> vector<8x1xf32>
    %20 = vector.broadcast %19 : vector<8x1xf32> to vector<8x32xf32>
    %21 = arith.mulf %8, %20 : vector<8x32xf32>
    %22 = vector.broadcast %1 : vector<1x32xf32> to vector<8x32xf32>
    %23 = arith.mulf %21, %22 : vector<8x32xf32>
    %24 = vector.broadcast %2 : vector<1x32xf32> to vector<8x32xf32>
    %25 = arith.addf %23, %24 : vector<8x32xf32>
    %c0_10 = arith.constant 0 : index
    %c0_11 = arith.constant 0 : index
    %26 = vector.load %arg4[%c0_10, %c0_11] : memref<8x32xf32, #tpu.memory_space<vmem>>, vector<8x32xf32>
    tpu.vector_store %arg4[%c0_10, %c0_11], %25 {strides = array<i32>} : memref<8x32xf32, #tpu.memory_space<vmem>>, vector<8x32xf32>,
    return
  }
  func.func @transform_0(%arg0: i32) -> (i32, i32) {
    %c0_i32 = arith.constant 0 : i32
    %c0_i32_0 = arith.constant 0 : i32
    return %arg0, %c0_i32 : i32, i32
  }
  func.func @transform_1(%arg0: i32) -> (i32, i32) {
    %c0_i32 = arith.constant 0 : i32
    %c0_i32_0 = arith.constant 0 : i32
    %c0_i32_1 = arith.constant 0 : i32
    return %c0_i32, %c0_i32_0 : i32, i32
  }
  func.func @transform_2(%arg0: i32) -> (i32, i32) {
    %c0_i32 = arith.constant 0 : i32
    %c0_i32_0 = arith.constant 0 : i32
    %c0_i32_1 = arith.constant 0 : i32
    return %c0_i32, %c0_i32_0 : i32, i32
  }
  func.func @transform_3(%arg0: i32) -> (i32, i32) {
    %c0_i32 = arith.constant 0 : i32
    %c0_i32_0 = arith.constant 0 : i32
    return %arg0, %c0_i32 : i32, i32
  }
}

</mosaic_0001>

<bundles_post_ra>
// kernel: tpu_custom_call.1
= control target key start
LH: loop header
LB: loop body
LE: loop exit
PB: predicated region body
PF: predicated region fallthrough
CT: control target
= control target key end

     0   :  { %8 = vsyncpa [#allocation3], 0  ;;  %s644_s0 = inlined_call_operand.hbm [shape: f32[16,32], index: 0, kind: input, shape index: {}]   ;;  %s645_s1 = inlined_call_operand.vmem [shape: f32[1,32], index: 1, kind: input, shape index: {}]   ;;  %s646_s2 = inlined_call_operand.vmem [shape: f32[1,32], index: 2, kind: input, shape index: {}]   ;;  %s647_s3 = inlined_call_operand.hbm [shape: f32[16,32], index: 3, kind: output, shape index: {}]  }
   0x1   :  { %10 = vsyncpa [#allocation3 + $0x1], 0 }
   0x2   :  { %11 = vsyncpa [#allocation4], 0 }
   0x3   :  { %13 = vsyncpa [#allocation4 + $0x1], 0  ;;  %s490_s12 = smov 0   ;;  %s492_s13 = smov 0  }
   0x4   :  { %s494_s14 = smov 0   ;;  %s496_s15 = smov 0  }
   0x5 LB: > { %s511_s16 = sadd.s32 4294967295, %s466_s15   ;;  %s310_s17 = sadd.s32 4294967294, %s466_s15   ;;  %s466_s15 = sphi %s496_s15, %s664_s15   ;;  %s462_s14 = sphi %s494_s14, %s663_s14   ;;  %s458_s13 = sphi %s492_s13, %s662_s13   ;;  %s454_s12 = sphi %s490_s12, %s661_s12  }
   0x6   : > { %s515_s18 = sadd.s32 1, %s466_s15   ;;  %s26_s19 = sadd.s32 1, %s462_s14 }
   0x7   : > { %s23_s20 = ssub.s32 %s466_s15, %s515_s18  ;;  %p33_p0 = scmp.ne.s32.totalorder %s462_s14, %s458_s13 }
   0x8   : > { %p24_p1 = scmp.eq.s32.totalorder %s23_s20, 0  ;;  %p34_p2 = scmp.eq.s32.totalorder %s466_s15, 0 }
   0x9   : > { %p39_p3 = scmp.ne.s32.totalorder %s458_s13, %s454_s12  ;;  %p40_p4 = scmp.eq.s32.totalorder %s511_s16, 0 }
   0xa   : > { %s527_s21 = scalar_select %p24_p1, %s462_s14, %s26_s19  }
   0xb   : > { %p529_p5 = por %p34_p2, %p33_p0  ;;  %p533_p6 = por %p40_p4, %p39_p3 }
   0xc   : > { %p105_p7 = scmp.eq.s32.totalorder %s511_s16, 1  ;;  %p111_p8 = scmp.eq.s32.totalorder %s310_s17, 1 }
   0xd   : > { %s651_s23 = scalar_select %p533_p6, 1, 0 }
   0xe   : > { %p336_p10 = scmp.lt.s32.totalorder %s466_s15, 2  ;;  %p540_p11 = por %p105_p7, %p33_p0 }
   0xf   : > { %p544_p12 = por %p111_p8, %p39_p3  ;;  %s137_s26 = sand.u32 1, %s462_s14  }
  0x10   : > { %s652_s24 = scalar_select %p540_p11, 1, 0 }
  0x11   : > { %s653_s25 = scalar_select %p544_p12, 1, 0 }
  0x12   : > { %s314_s27 = sshll.u32 %s466_s15, 7  ;;  %s313_s28 = sshll.u32 %s137_s26, 3 }
  0x13   : > { %s553_s4 = scalar_lea.hbm %s644_s0, %s314_s27  ;;  %s141_s5 = scalar_lea.vmem [#allocation2], %s313_s28 }
  0x14   : > { %s148_s6 = sshll.u32 %s141_s5, 4  ;;  %p557_p13 = pnand %p336_p10, %p529_p5  ;;  %s561_s6 = int_to_ptr.vmem [resolvable:$true] %s148_s6 }
  0x15   : > { %s138_s8 = scalar_lea.sflag [#allocation3], %s137_s26  ;;  %s374_s9 = scalar_lea.hbm %s553_s4, 128 }
  0x16   : > { %p375_p2 = scmp.ne.s32.totalorder %s553_s4, %s374_s9  ;;  %p376_p3 = pneg %p557_p13 }
  0x17   : > { %s379_s17 = scalar_lea.hbm %s644_s0, 256  ;;  %p380_p5 = scmp.lt.s32.totalorder %s553_s4, %s644_s0 }
  0x18   : > { %p377_p4 = pnand %p376_p3, %p375_p2  ;;  %p381_p8 = scmp.lt.s32.totalorder %s379_s17, %s374_s9 }
  0x1a   : > { %p378_p7 = pneg %p377_p4  ;;  %p382_p10 = por %p381_p8, %p380_p5 }
  0x1c   : > { %p383_p9 = pnand %p382_p10, %p378_p7 }
  0x1e   : > { %386 = shalt.err (!%p383_p9)
}
  0x1f   : > { %s387_s22 = scalar_lea.vmem %s561_s6, 128  ;;  %s468_s26 = smov [#allocation2]  }
  0x20   : > { %p388_p0 = scmp.ne.s32.totalorder %s561_s6, %s387_s22  ;;  %s392_s27 = sshll.u32 %s468_s26, 4  ;;  %s393_s27 = int_to_ptr.vmem [resolvable:$false] %s392_s27 }
  0x21   : > { %s394_s28 = scalar_lea.vmem %s393_s27, 256  ;;  %p395_p4 = scmp.lt.s32.totalorder %s561_s6, %s393_s27 }
  0x22   : > { %p390_p1 = pnand %p388_p0, %p376_p3  ;;  %p396_p12 = scmp.lt.s32.totalorder %s394_s28, %s387_s22 }
  0x24   : > { %p391_p2 = pneg %p390_p1  ;;  %p397_p11 = por %p396_p12, %p395_p4 }
  0x26   : > { %p398_p6 = pnand %p397_p11, %p391_p2 }
  0x28   : > { %401 = shalt.err (!%p398_p6)
}
  0x29   : > { %331 = dma.hbm_to_vmem [thread:$0]  (!%p557_p13), %s553_s4, 128, %s561_s6, %s138_s8  }
  0x2a   : > { %p655_p9 = scmp.lt.s32.totalorder %s466_s15, 3  ;;  %p656_p7 = scmp.ge.s32.totalorder %s466_s15, 1 }
  0x2c   : > { %p154_p0 = pnand %p656_p7, %p655_p9 }
  0x2d   : > { %s588_s29 = sand.u32 (!%p154_p0), 1, %s458_s13   ;;  %p657_p6 = scmp.ne.s32.totalorder (!%p154_p0), %s651_s23, 0 }
  0x2e   : > { %157 = sbr.rel (%p154_p0) target bundleno = 394 (0x18a), region = 32  ;;  %s316_s30 = sshll.u32 (!%p154_p0), %s588_s29, 3 }
  0x2f   : > { %s160_s5 = scalar_lea.sflag (!%p154_p0), [#allocation3], %s588_s29  ;;  %s163_s7 = scalar_lea.vmem (!%p154_p0), [#allocation2], %s316_s30 }
  0x33   : > { %445 = dma.done.wait (%p657_p6), %s160_s5, 128  }
  0x34   : > { %447 = vsyncadd (%p657_p6), %s160_s5, 4294967168  ;;  %vm189_vm0 = vcmask 261120   ;;  %v186_v0 = vld [vmem:[%s163_s7] sm:$0xff]  ;;  %s321_s9 = sshll.u32 %s511_s16, 7  ;;  %s185_s10 = scalar_lea.vmem [#allocation5], %s316_s30 }
  0x35   : > { %v190_v1 = vsel %vm189_vm0, %v186_v0, 0.0  ;;  %v318_v17 = vld [vmem:[%s645_s1] ss:$0 sm:$0xff]  ;;  %s240_s11 = sshll.u32 %s185_s10, 4  ;;  %s238_s20 = scalar_lea.hbm %s647_s3, %s321_s9  ;;  %s241_s11 = int_to_ptr.vmem [resolvable:$true] %s240_s11 }
  0x36   : > { %191 = vadd.xlane.f32.xlu0 %v190_v1  ;;  %v319_v19 = vld [vmem:[%s646_s2] ss:$0 sm:$0xff]  ;;  %s227_s22 = scalar_lea.sflag [#allocation4], %s588_s29  ;;  %s402_s26 = scalar_lea.vmem %s241_s11, 128 }
  0x37   : > { %p403_p11 = scmp.ne.s32.totalorder %s241_s11, %s402_s26  ;;  %p658_p12 = scmp.ne.s32.totalorder %s652_s24, 0 }
  0x38   : > { %s469_s27 = smov [#allocation5]  }
  0x39   : > { %p404_p13 = pnand %p403_p11, %p658_p12  ;;  %s406_s16 = sshll.u32 %s469_s27, 4  ;;  %s407_s16 = int_to_ptr.vmem [resolvable:$false] %s406_s16 }
  0x3a   : > { %s408_s28 = scalar_lea.vmem %s407_s16, 256  ;;  %p409_p3 = scmp.lt.s32.totalorder %s241_s11, %s407_s16 }
  0x3b   : > { %p405_p1 = pneg %p404_p13  ;;  %p410_p5 = scmp.lt.s32.totalorder %s408_s28, %s402_s26 }
  0x3d   : > { %p411_p8 = por %p410_p5, %p409_p3 }
  0x3f   : > { %p412_p10 = pnand %p411_p8, %p405_p1 }
  0xbf   : > { %v192_v2 = vpop.xlane.xlu0 %191 }
  0xc0   : > { %v193_v3 = vmul.f32 0.03125, %v192_v2 }
  0xc2   : > { %v194_v4 = vsub.f32 %v186_v0, %v193_v3 }
  0xc4   : > { %v195_v5 = vmul.f32 %v194_v4, %v194_v4 }
  0xc6   : > { %v196_v6 = vsel %vm189_vm0, %v195_v5, 0.0 }
  0xc7   : > { %197 = vadd.xlane.f32.xlu0 %v196_v6 }
 0x150   : > { %v198_v7 = vpop.xlane.xlu0 %197 }
 0x151   : > { %v199_v8 = vmul.f32 0.032258064, %v198_v7 }
 0x153   : > { %v200_v9 = vmax.f32 %v199_v8, 0.0 }
 0x155   : > { %370 = vrsqrt.f32 %v200_v9  ;;  %vm203_vm1 = vcmp.eq.f32.partialorder %v200_v9, inf  ;;  %v206_v12 = vand.u32 2147483648, %v200_v9  ;;  %vm205_vm2 = vcmp.eq.f32.partialorder %v200_v9, 0.0 }
 0x162   : > { %v371_v10 = vpop.eup %370 }
 0x163   : > { %v202_v11 = vmul.f32 %v371_v10, %v200_v9 }
 0x165   : > { %v204_v13 = vsel %vm203_vm1, %v200_v9, %v202_v11 }
 0x166   : > { %v207_v14 = vsel %vm205_vm2, %v206_v12, %v204_v13 }
 0x167   : > { %v208_v15 = vadd.f32 1e-06, %v207_v14 }
 0x169   : > { %372 = vrcp.f32 %v208_v15 }
 0x176   : > { %v373_v16 = vpop.eup %372 }
 0x177   : > { %v210_v18 = vmul.f32 %v373_v16, %v194_v4 }
 0x179   : > { %v217_v20 = vmul.f32 %v318_v17, %v210_v18 }
 0x17b   : > { %v224_v21 = vadd.f32 %v319_v19, %v217_v20 }
 0x17d   : > { %225 = vst.msk [vmem:[%s185_s10] sm:$0xff] %vm189_vm0, %v224_v21 }
 0x17e   : > { %415 = shalt.err (!%p412_p10)
}
 0x17f   : > { %s416_s30 = scalar_lea.hbm %s238_s20, 128  ;;  %s420_s7 = scalar_lea.hbm %s647_s3, 256 }
 0x180   : > { %p417_p2 = scmp.ne.s32.totalorder %s238_s20, %s416_s30  ;;  %p421_p7 = scmp.lt.s32.totalorder %s238_s20, %s647_s3 }
 0x181   : > { %p422_p0 = scmp.lt.s32.totalorder %s420_s7, %s416_s30 }
 0x182   : > { %p418_p4 = pnand %p417_p2, %p658_p12 }
 0x183   : > { %p423_p6 = por %p422_p0, %p421_p7 }
 0x184   : > { %p419_p9 = pneg %p418_p4 }
 0x186   : > { %p424_p11 = pnand %p423_p6, %p419_p9 }
 0x188   : > { %427 = shalt.err (!%p424_p11)
}
 0x189   : > { %326 = dma.vmem_to_hbm [thread:$0]  (%p658_p12), %s241_s11, 128, %s238_s20, %s227_s22  }
 0x18a PF: > { %s252_s6 = sand.u32 1, %s454_s12   ;;  %p659_p13 = scmp.ne.s32.totalorder %s653_s25, 0 }
 0x18b   : > { %p660_p1 = scmp.ge.s32.totalorder %s466_s15, 2  ;;  %s253_s8 = scalar_lea.sflag [#allocation4], %s252_s6 }
 0x18d   : > { %p333_p3 = pnand %p660_p1, %p659_p13 }
 0x18f   : > { %p334_p5 = pneg %p333_p3 }
 0x191   : > { %449 = dma.done.wait (%p334_p5), %s253_s8, 128  }
 0x192   : > { %451 = vsyncadd (%p334_p5), %s253_s8, 4294967168  ;;  %p16_p8 = scmp.ge.s32.totalorder %s515_s18, 4   ;;  %s661_s12 = smov %s458_s13 }
 0x193   : > { %s662_s13 = smov %s462_s14  ;;  %s663_s14 = smov %s527_s21 }
 0x194   : > { %s664_s15 = smov %s515_s18  ;;  %18 = sbr.rel (!%p16_p8) target bundleno = 5 (0x5), region = 77 }
 0x199   :  { %258 = vsyncpa [#allocation3], 1 }
 0x19a   :  { %260 = vsyncpa [#allocation3 + $0x1], 1 }
 0x19b   :  { %261 = vsyncpa [#allocation4], 1 }
 0x19c   :  { %263 = vsyncpa [#allocation4 + $0x1], 1 }

</bundles_post_ra>
